<compile_context>
chip_gen: v5e
topology: v5e:2x2
jax: 0.10.0
libtpu: 0.0.40
codegen_flags: <defaults>
</compile_context>

<pallas_src>
import functools
import math

import jax
import jax.numpy as jnp
from jax.experimental import pallas as pl
from jax.experimental.pallas import tpu as pltpu


def _asym_ce_terms(x, y, shift, eps):
    """Elementwise y*log(clamp(sig(x),eps)) + (1-y)*log(clamp(neg,eps)) terms
    (un-negated, un-summed; matches NCRLoss.compute_CE before the sum)."""
    if shift is not None and shift > 0.0:
        # General path: mirrors the PyTorch formulation literally.
        x_sig = jax.nn.sigmoid(x)
        xs_pos = x_sig
        xs_neg = jnp.minimum(1.0 - x_sig + shift, 1.0)
        los_pos = y * jnp.log(jnp.maximum(xs_pos, eps))
        los_neg = (1.0 - y) * jnp.log(jnp.maximum(xs_neg, eps))
        return los_pos + los_neg
    # shift == 0 fast path: log-sigmoid via a shared softplus term.
    #   log(sigmoid(x))     = min(x, 0) - log1p(exp(-|x|))
    #   log(1 - sigmoid(x)) = -max(x, 0) - log1p(exp(-|x|))
    # log is monotonic, so log(max(sig, eps)) == max(log_sig, log(eps)) and the
    # eps-clamp semantics of the reference are preserved.
    log_eps = math.log(eps)
    u = jnp.exp(-jnp.abs(x))
    v = 1.0 + u
    # log1p(u) without relying on a log1p lowering rule: when 1+u rounds to
    # exactly 1.0 the first-order series log1p(u) ~= u is exact to f32 eps.
    t = jnp.where(v == 1.0, u, jnp.log(v))
    log_sig_pos = jnp.minimum(x, 0.0) - t
    log_sig_neg = -jnp.maximum(x, 0.0) - t
    los_pos = y * jnp.maximum(log_sig_pos, log_eps)
    los_neg = (1.0 - y) * jnp.maximum(log_sig_neg, log_eps)
    return los_pos + los_neg


def _ncr_loss_kernel(logits_ref, labels_ref, out_ref, *, shift, is_reg, eps,
                     batch, mask_padding):
    # Blocks arrive in the natural (TB, C) layout (contiguous HBM->VMEM DMA,
    # full last dim).  Upcast to f32, then relayout to lane-dense (C, TB) on
    # the otherwise-idle XLU so the dominant VPU/EUP work uses all 128 lanes
    # even when C << 128.
    x = jnp.transpose(logits_ref[...].astype(jnp.float32))   # (C, TB)
    y = jnp.transpose(labels_ref[...].astype(jnp.float32))   # (C, TB)
    C, TB = x.shape

    th = x[0:1, :]      # (1, TB) threshold ("NA") logits (static row slice)
    lab0 = y[0:1, :]    # (1, TB) "NA" labels

    # --- part 1: rel_margin[c] = logits[:, c] - logits[:, 0] ---------------
    # Row 0 (NA vs itself) is excluded by subtracting its (1, TB) contribution
    # rather than building a full (C, TB) iota mask.
    rel_margin = x - th
    ce = _asym_ce_terms(rel_margin, y, shift, eps)                  # (C, TB)
    per_lane = jnp.sum(ce, axis=0, keepdims=True) - ce[0:1, :]      # (1, TB)

    # --- part 2 (isReg): na_margin = logits[:, 0] - mean(logits[:, 1:]) ----
    if is_reg:
        row_sum = jnp.sum(x, axis=0, keepdims=True)                 # (1, TB)
        mean_rest = (row_sum - th) * (1.0 / (C - 1))
        na_margin = th - mean_rest
        per_lane = per_lane + _asym_ce_terms(na_margin, lab0, shift, eps)

    # Discard the undefined lanes of an overhanging last block (no wrapper
    # padding): global batch index = program_id * TB + lane.
    if mask_padding:
        lane = jax.lax.broadcasted_iota(jnp.int32, (1, TB), 1)
        valid = (lane + pl.program_id(0) * TB) < batch
        per_lane = jnp.where(valid, per_lane, 0.0)

    tile_loss = -jnp.sum(per_lane)
    # Per-tile partial sum, broadcast into this tile's lane-dense (8,128)
    # output block; the wrapper reduces the per-tile partials.
    out_ref[...] = jnp.full(out_ref.shape, tile_loss, dtype=out_ref.dtype)


def ncr_loss(logits, labels, *, shift=0.0, is_reg=True, eps=1e-8,
             reduction='mean', batch_tile=None):
    """Pallas TPU implementation of NCRLoss.forward for (B, C) logits/labels."""
    assert logits.shape == labels.shape and logits.ndim == 2
    B, C = logits.shape
    assert C >= 2, "need at least the NA class + one relation class"

    # ---- batch-tile sizing (VMEM-budget + megacore aware) ------------------
    # Keep each f32 (C, tb) tensor <= ~1 MiB so the double-buffered input
    # blocks plus a handful of f32 temporaries stay well under the 32 MiB
    # scoped VMEM we request (v7x only has 64 MiB physical).  For C ~= 16 this
    # gives tb = 16384 (~1 MiB blocks), squarely in the DMA-roofline range.
    elems_cap = (1024 * 1024) // 4
    tb_cap = min(32768, max(128, (elems_cap // C) // 128 * 128))
    if batch_tile is None:
        # Prefer >= 2 grid steps so the "parallel" grid axis can shard the
        # work across both TensorCores on v7x (harmless on v5e/v6e).
        half = (((B + 1) // 2) + 127) // 128 * 128
        batch_tile = max(128, half)
    tb = min(batch_tile, tb_cap)

    if B <= tb:
        tb = B                              # single block == full array dims
        grid = 1
    else:
        tb = max(128, (tb // 128) * 128)    # lane-aligned tiles
        grid = pl.cdiv(B, tb)
    mask_padding = (grid * tb != B)         # overhanging last block -> mask

    kernel = functools.partial(
        _ncr_loss_kernel, shift=shift, is_reg=is_reg, eps=eps, batch=B,
        mask_padding=mask_padding)

    partials = pl.pallas_call(
        kernel,
        out_shape=jax.ShapeDtypeStruct((grid, 8, 128), jnp.float32),
        grid=(grid,),
        in_specs=[pl.BlockSpec((tb, C), lambda i: (i, 0)),
                  pl.BlockSpec((tb, C), lambda i: (i, 0))],
        out_specs=pl.BlockSpec((1, 8, 128), lambda i: (i, 0, 0)),
        compiler_params=pltpu.CompilerParams(
            dimension_semantics=("parallel",),       # shards across TCs on v7x
            vmem_limit_bytes=32 * 1024 * 1024),
    )(logits, labels)

    loss = jnp.sum(partials[:, 0, 0])                # sum per-tile partials (f32)
    if reduction == 'mean':
        loss = loss / jnp.float32(B)                 # true B (no padding used)
    return loss


def _ncr_loss_ref(logits, labels, *, shift=0.0, is_reg=True, eps=1e-8,
                  reduction='mean'):
    """Pure-JAX reference mirroring the PyTorch module (for verification)."""
    logits = logits.astype(jnp.float32)
    labels = labels.astype(jnp.float32)

    def compute_ce(x, y):
        x_sig = jax.nn.sigmoid(x)
        xs_pos = x_sig
        xs_neg = 1.0 - x_sig
        if shift is not None and shift > 0:
            xs_neg = jnp.minimum(xs_neg + shift, 1.0)
        los_pos = y * jnp.log(jnp.maximum(xs_pos, eps))
        los_neg = (1.0 - y) * jnp.log(jnp.maximum(xs_neg, eps))
        return -jnp.sum(los_pos + los_neg)

    rel_margin = logits[:, 1:] - logits[:, 0:1]
    loss = compute_ce(rel_margin, labels[:, 1:])
    if is_reg:
        na_margin = logits[:, 0] - jnp.mean(logits[:, 1:], axis=-1)
        loss = loss + compute_ce(na_margin, labels[:, 0])
    if reduction == 'mean':
        loss = loss / logits.shape[0]
    return loss


def _make_inputs(key, B, C, dtype=jnp.float32):
    k_logits, k_labels = jax.random.split(key)
    logits = jax.random.normal(k_logits, (B, C), dtype=jnp.float32) * 2.0
    labels = (jax.random.uniform(k_labels, (B, C)) > 0.7).astype(jnp.float32)
    # NA label set iff no relation label active (column 0 = threshold class).
    has_rel = jnp.sum(labels[:, 1:], axis=1) > 0
    labels = labels.at[:, 0].set(jnp.where(has_rel, 0.0, 1.0))
    return logits.astype(dtype), labels.astype(dtype)


if __name__ == "__main__":
    key = jax.random.PRNGKey(0)
    k1, k2, k3 = jax.random.split(key, 3)

    # 1) Small f32 case, single block (default params: shift=0, isReg, mean).
    logits, labels = _make_inputs(k1, B=8, C=16)
    got = jax.block_until_ready(ncr_loss(logits, labels))
    want = jax.block_until_ready(_ncr_loss_ref(logits, labels))
    assert jnp.allclose(got, want, rtol=1e-4, atol=1e-4), (got, want)

    # 2) Multi-tile grid (default sizing -> tb=256, grid=2) with an
    #    overhanging, lane-masked last block (no wrapper-side padding copy).
    logits, labels = _make_inputs(k2, B=320, C=16)
    got = jax.block_until_ready(ncr_loss(logits, labels))
    want = jax.block_until_ready(_ncr_loss_ref(logits, labels))
    assert jnp.allclose(got, want, rtol=1e-4, atol=1e-4), (got, want)

    # 3) shift > 0 path, 'sum' reduction, no regularizer, explicit small tile
    #    (3-step pipeline with a masked last block).
    got = jax.block_until_ready(
        ncr_loss(logits, labels, shift=0.1, is_reg=False, reduction='sum',
                 batch_tile=128))
    want = jax.block_until_ready(
        _ncr_loss_ref(logits, labels, shift=0.1, is_reg=False, reduction='sum'))
    assert jnp.allclose(got, want, rtol=1e-3, atol=1e-3), (got, want)

    # 4) bf16 inputs (kernel upcasts to f32 before the in-VMEM relayout).
    logits, labels = _make_inputs(k3, B=64, C=16, dtype=jnp.bfloat16)
    got = jax.block_until_ready(ncr_loss(logits, labels))
    want = jax.block_until_ready(_ncr_loss_ref(logits, labels))
    assert jnp.allclose(got, want, rtol=1e-3, atol=1e-3), (got, want)

    print("KERNEL_OK")
</pallas_src>

<mosaic_0001>
module attributes {stable_mosaic.version = 11 : i64} {
  func.func @_ncr_loss_kernel(%arg0: i32, %arg1: memref<8x16xf32, #tpu.memory_space<vmem>>, %arg2: memref<8x16xf32, #tpu.memory_space<vmem>>, %arg3: memref<1x8x128xf32, #tpu.memory_space<vmem>>) attributes {dimension_semantics = [#tpu.dimension_semantics<parallel>], iteration_bounds = array<i64: 1>, scalar_prefetch = 0 : i64, scratch_operands = 0 : i64, tpu.core_type = #tpu.core_type<tc>, window_params = [{transform_indices = @transform_0, window_bounds = array<i64: 8, 16>}, {transform_indices = @transform_1, window_bounds = array<i64: 8, 16>}, {transform_indices = @transform_2, window_bounds = array<i64: 1, 8, 128>}]} {
    %c0 = arith.constant 0 : index
    %c0_0 = arith.constant 0 : index
    %0 = vector.load %arg1[%c0, %c0_0] : memref<8x16xf32, #tpu.memory_space<vmem>>, vector<8x16xf32>
    %1 = tpu.transpose %0, [1, 0] : vector<8x16xf32> -> vector<16x8xf32>
    %c0_1 = arith.constant 0 : index
    %c0_2 = arith.constant 0 : index
    %2 = vector.load %arg2[%c0_1, %c0_2] : memref<8x16xf32, #tpu.memory_space<vmem>>, vector<8x16xf32>
    %3 = tpu.transpose %2, [1, 0] : vector<8x16xf32> -> vector<16x8xf32>
    %4 = vector.extract_strided_slice %1 {offsets = [0, 0], sizes = [1, 8], strides = [1, 1]} : vector<16x8xf32> to vector<1x8xf32>
    %5 = vector.extract_strided_slice %3 {offsets = [0, 0], sizes = [1, 8], strides = [1, 1]} : vector<16x8xf32> to vector<1x8xf32>
    %6 = vector.broadcast %4 : vector<1x8xf32> to vector<16x8xf32>
    %7 = arith.subf %1, %6 : vector<16x8xf32>
    %8 = math.absf %7 : vector<16x8xf32>
    %cst = arith.constant 0.000000e+00 : f32
    %9 = vector.broadcast %cst : f32 to vector<16x8xf32>
    %10 = arith.subf %9, %8 : vector<16x8xf32>
    %11 = math.exp %10 : vector<16x8xf32>
    %cst_3 = arith.constant 1.000000e+00 : f32
    %12 = vector.broadcast %cst_3 : f32 to vector<16x8xf32>
    %13 = arith.addf %12, %11 : vector<16x8xf32>
    %cst_4 = arith.constant 1.000000e+00 : f32
    %14 = vector.broadcast %cst_4 : f32 to vector<16x8xf32>
    %15 = arith.cmpf oeq, %13, %14 : vector<16x8xf32>
    %16 = math.log %13 : vector<16x8xf32>
    %17 = arith.select %15, %11, %16 : vector<16x8xi1>, vector<16x8xf32>
    %cst_5 = arith.constant 0.000000e+00 : f32
    %18 = vector.broadcast %cst_5 : f32 to vector<16x8xf32>
    %19 = arith.minimumf %7, %18 : vector<16x8xf32>
    %20 = arith.subf %19, %17 : vector<16x8xf32>
    %cst_6 = arith.constant 0.000000e+00 : f32
    %21 = vector.broadcast %cst_6 : f32 to vector<16x8xf32>
    %22 = arith.maximumf %7, %21 : vector<16x8xf32>
    %cst_7 = arith.constant 0.000000e+00 : f32
    %23 = vector.broadcast %cst_7 : f32 to vector<16x8xf32>
    %24 = arith.subf %23, %22 : vector<16x8xf32>
    %25 = arith.subf %24, %17 : vector<16x8xf32>
    %cst_8 = arith.constant -18.420681 : f32
    %26 = vector.broadcast %cst_8 : f32 to vector<16x8xf32>
    %27 = arith.maximumf %20, %26 : vector<16x8xf32>
    %28 = arith.mulf %3, %27 : vector<16x8xf32>
    %cst_9 = arith.constant 1.000000e+00 : f32
    %29 = vector.broadcast %cst_9 : f32 to vector<16x8xf32>
    %30 = arith.subf %29, %3 : vector<16x8xf32>
    %cst_10 = arith.constant -18.420681 : f32
    %31 = vector.broadcast %cst_10 : f32 to vector<16x8xf32>
    %32 = arith.maximumf %25, %31 : vector<16x8xf32>
    %33 = arith.mulf %30, %32 : vector<16x8xf32>
    %34 = arith.addf %28, %33 : vector<16x8xf32>
    %cst_11 = arith.constant dense<0.000000e+00> : vector<8xf32>
    %35 = vector.multi_reduction <add>, %34, %cst_11 [0] : vector<16x8xf32> to vector<8xf32>
    %36 = vector.shape_cast %35 : vector<8xf32> to vector<1x8xf32>
    %37 = vector.extract_strided_slice %34 {offsets = [0, 0], sizes = [1, 8], strides = [1, 1]} : vector<16x8xf32> to vector<1x8xf32>
    %38 = arith.subf %36, %37 : vector<1x8xf32>
    %cst_12 = arith.constant dense<0.000000e+00> : vector<8xf32>
    %39 = vector.multi_reduction <add>, %1, %cst_12 [0] : vector<16x8xf32> to vector<8xf32>
    %40 = vector.shape_cast %39 : vector<8xf32> to vector<1x8xf32>
    %41 = arith.subf %40, %4 : vector<1x8xf32>
    %cst_13 = arith.constant 0.0666666701 : f32
    %42 = vector.broadcast %cst_13 : f32 to vector<1x8xf32>
    %43 = arith.mulf %41, %42 : vector<1x8xf32>
    %44 = arith.subf %4, %43 : vector<1x8xf32>
    %45 = math.absf %44 : vector<1x8xf32>
    %cst_14 = arith.constant 0.000000e+00 : f32
    %46 = vector.broadcast %cst_14 : f32 to vector<1x8xf32>
    %47 = arith.subf %46, %45 : vector<1x8xf32>
    %48 = math.exp %47 : vector<1x8xf32>
    %cst_15 = arith.constant 1.000000e+00 : f32
    %49 = vector.broadcast %cst_15 : f32 to vector<1x8xf32>
    %50 = arith.addf %49, %48 : vector<1x8xf32>
    %cst_16 = arith.constant 1.000000e+00 : f32
    %51 = vector.broadcast %cst_16 : f32 to vector<1x8xf32>
    %52 = arith.cmpf oeq, %50, %51 : vector<1x8xf32>
    %53 = math.log %50 : vector<1x8xf32>
    %54 = arith.select %52, %48, %53 : vector<1x8xi1>, vector<1x8xf32>
    %cst_17 = arith.constant 0.000000e+00 : f32
    %55 = vector.broadcast %cst_17 : f32 to vector<1x8xf32>
    %56 = arith.minimumf %44, %55 : vector<1x8xf32>
    %57 = arith.subf %56, %54 : vector<1x8xf32>
    %cst_18 = arith.constant 0.000000e+00 : f32
    %58 = vector.broadcast %cst_18 : f32 to vector<1x8xf32>
    %59 = arith.maximumf %44, %58 : vector<1x8xf32>
    %cst_19 = arith.constant 0.000000e+00 : f32
    %60 = vector.broadcast %cst_19 : f32 to vector<1x8xf32>
    %61 = arith.subf %60, %59 : vector<1x8xf32>
    %62 = arith.subf %61, %54 : vector<1x8xf32>
    %cst_20 = arith.constant -18.420681 : f32
    %63 = vector.broadcast %cst_20 : f32 to vector<1x8xf32>
    %64 = arith.maximumf %57, %63 : vector<1x8xf32>
    %65 = arith.mulf %5, %64 : vector<1x8xf32>
    %cst_21 = arith.constant 1.000000e+00 : f32
    %66 = vector.broadcast %cst_21 : f32 to vector<1x8xf32>
    %67 = arith.subf %66, %5 : vector<1x8xf32>
    %cst_22 = arith.constant -18.420681 : f32
    %68 = vector.broadcast %cst_22 : f32 to vector<1x8xf32>
    %69 = arith.maximumf %62, %68 : vector<1x8xf32>
    %70 = arith.mulf %67, %69 : vector<1x8xf32>
    %71 = arith.addf %65, %70 : vector<1x8xf32>
    %72 = arith.addf %38, %71 : vector<1x8xf32>
    %73 = vector.shape_cast %72 : vector<1x8xf32> to vector<1x1x8xf32>
    %cst_23 = arith.constant dense<0.000000e+00> : vector<1xf32>
    %74 = vector.multi_reduction <add>, %73, %cst_23 [1, 2] : vector<1x1x8xf32> to vector<1xf32>
    %75 = vector.shape_cast %74 : vector<1xf32> to vector<1x1x1xf32>
    %76 = vector.extract %75[0, 0, 0] : f32 from vector<1x1x1xf32>
    %cst_24 = arith.constant 0.000000e+00 : f32
    %77 = arith.subf %cst_24, %76 : f32
    %78 = vector.broadcast %77 : f32 to vector<1x8x128xf32>
    %c0_25 = arith.constant 0 : index
    %c0_26 = arith.constant 0 : index
    %c0_27 = arith.constant 0 : index
    %79 = vector.load %arg3[%c0_25, %c0_26, %c0_27] : memref<1x8x128xf32, #tpu.memory_space<vmem>>, vector<1x8x128xf32>
    tpu.vector_store %arg3[%c0_25, %c0_26, %c0_27], %78 {strides = array<i32>} : memref<1x8x128xf32, #tpu.memory_space<vmem>>, vector<1x8x128xf32>,
    return
  }
  func.func @transform_0(%arg0: i32) -> (i32, i32) {
    %c0_i32 = arith.constant 0 : i32
    %c0_i32_0 = arith.constant 0 : i32
    return %arg0, %c0_i32 : i32, i32
  }
  func.func @transform_1(%arg0: i32) -> (i32, i32) {
    %c0_i32 = arith.constant 0 : i32
    %c0_i32_0 = arith.constant 0 : i32
    return %arg0, %c0_i32 : i32, i32
  }
  func.func @transform_2(%arg0: i32) -> (i32, i32, i32) {
    %c0_i32 = arith.constant 0 : i32
    %c0_i32_0 = arith.constant 0 : i32
    %c0_i32_1 = arith.constant 0 : i32
    return %arg0, %c0_i32, %c0_i32_0 : i32, i32, i32
  }
}

</mosaic_0001>

<bundles_post_ra>
// kernel: tpu_custom_call.1
= control target key start
LH: loop header
LB: loop body
LE: loop exit
PB: predicated region body
PF: predicated region fallthrough
CT: control target
= control target key end

     0   :  { %7 = vsyncpa [#allocation3], 0  ;;  %s356_s0 = inlined_call_operand.hbm [shape: f32[8,16], index: 0, kind: input, shape index: {}]   ;;  %s357_s1 = inlined_call_operand.hbm [shape: f32[8,16], index: 1, kind: input, shape index: {}]   ;;  %s358_s2 = inlined_call_operand.hbm [shape: f32[1,8,128], index: 2, kind: output, shape index: {}]  }
   0x1   :  { %8 = vsyncpa [#allocation6], 0 }
   0x2   :  { %9 = vsyncpa [#allocation4], 0  ;;  %s15_s11 = sshll.u32 %s356_s0, 4  ;;  %s320_s12 = smov [#allocation2]   ;;  %s16_s11 = int_to_ptr.hbm [resolvable:$true] %s15_s11 }
   0x3   :  { %s17_s13 = sshll.u32 %s320_s12, 4  ;;  %s26_s16 = sshll.u32 %s357_s1, 4  ;;  %s18_s13 = int_to_ptr.vmem [resolvable:$true] %s17_s13  ;;  %s27_s16 = int_to_ptr.hbm [resolvable:$true] %s26_s16 }
   0x4   :  { %20 = dma.hbm_to_vmem [thread:$0]  %s16_s11, 128, %s18_s13, [#allocation3]  }
   0x5   :  { %s321_s17 = smov [#allocation5]  }
   0x6   :  { %s28_s18 = sshll.u32 %s321_s17, 4  ;;  %s29_s18 = int_to_ptr.vmem [resolvable:$true] %s28_s18 }
   0x7   :  { %31 = dma.hbm_to_vmem [thread:$0]  %s27_s16, 128, %s29_s18, [#allocation6]  }
   0x8   :  { %314 = dma.done.wait [#allocation3], 128  }
   0x9   :  { %315 = vsyncadd [#allocation3], 4294967168 }
   0xa   :  { %316 = dma.done.wait [#allocation6], 128  }
   0xb   :  { %317 = vsyncadd [#allocation6], 4294967168  ;;  %v40_v0 = vld [vmem:[#allocation2] sm:$0xff]  ;;  %v73_v1 = vld [vmem:[#allocation5] sm:$0xff]  ;;  %vm149_vm0 = vcmask 64512   ;;  %vm192_vm4 = vcmask 57344  }
   0xc   :  { %41 = vxpose.xlu0.b32.start.end [1/1] (short) (narrow) %v40_v0, 16  ;;  %s322_s0 = smov [#allocation7]   ;;  %s213_s21 = sshll.u32 %s358_s2, 4  ;;  %s214_s21 = int_to_ptr.hbm [resolvable:$true] %s213_s21 }
   0xd   :  { %s211_s1 = sshll.u32 %s322_s0, 4  ;;  %s212_s1 = int_to_ptr.vmem [resolvable:$true] %s211_s1 }
  0x1c   :  { %74 = vxpose.xlu0.b32.start.end [1/1] (short) (narrow) %v73_v1, 16 }
  0xb0   :  { %v57_v2 = vpop.trf.xlu0 }
  0xb1   :  { %v106_v3 = vperm.slane %v57_v2, 0  ;;  %v160_v9 = vsel %vm149_vm0, %v57_v2, 0.0 }
  0xb3   :  { %v107_v4 = vsub.f32 %v57_v2, %v106_v3 }
  0xb5   :  { %v109_v5 = vand.u32 2147483647, %v107_v4  ;;  %v131_v26 = vmax.f32 %v107_v4, 0.0  ;;  %v127_v32 = vmin.f32 %v107_v4, 0.0 }
  0xb7   :  { %v111_v6 = vsub.f32 0.0, %v109_v5  ;;  %v133_v33 = vsub.f32 0.0, %v131_v26 }
  0xb8   :  { %v58_v7 = vpop.trf.xlu0 }
  0xb9   :  { %v113_v8 = vmul.f32 1.442695, %v111_v6  ;;  %v108_v10 = vsub.f32 %v58_v7, %v106_v3  ;;  %v161_v11 = vsel %vm149_vm0, %v58_v7, 0.0 }
  0xba   :  { %v162_v12 = vadd.f32 %v161_v11, %v160_v9 }
  0xbb   :  { %230 = vpow2.f32 %v113_v8  ;;  %v110_v13 = vand.u32 2147483647, %v108_v10  ;;  %v132_v36 = vmax.f32 %v108_v10, 0.0  ;;  %v128_v49 = vmin.f32 %v108_v10, 0.0 }
  0xbc   :  { %v163_v14 = vrot.slane %v162_v12, 4 }
  0xbd   :  { %v112_v15 = vsub.f32 0.0, %v110_v13  ;;  %v134_v47 = vsub.f32 0.0, %v132_v36 }
  0xbe   :  { %v164_v16 = vadd.f32 %v163_v14, %v162_v12 }
  0xbf   :  { %v115_v17 = vmul.f32 1.442695, %v112_v15 }
  0xc0   :  { %v165_v18 = vrot.slane %v164_v16, 2  ;;  %v346_v24 = vpop.trf.xlu0 }
  0xc1   :  { %v231_v19 = vpop.eup %230  ;;  %232 = vpow2.f32 %v115_v17  ;;  %v141_v44 = vsub.f32 1.0, %v346_v24 }
  0xc2   :  { %v166_v20 = vadd.f32 %v165_v18, %v164_v16  ;;  %v117_v21 = vadd.f32 1.0, %v231_v19 }
  0xc4   :  { %v167_v22 = vrot.slane %v166_v20, 1  ;;  %234 = vlog2.f32 %v117_v21  ;;  %vm119_vm1 = vcmp.eq.f32.partialorder %v117_v21, 1.0 }
  0xc6   :  { %v168_v23 = vadd.f32 %v167_v22, %v166_v20 }
  0xc7   :  { %v233_v25 = vpop.eup %232 }
  0xc8   :  { %v169_v27 = vsub.f32 %v168_v23, %v57_v2  ;;  %v118_v28 = vadd.f32 1.0, %v233_v25  ;;  %v91_v45 = vpop.trf.xlu0 }
  0xc9   :  { %v142_v52 = vsub.f32 1.0, %v91_v45 }
  0xca   :  { %v235_v29 = vpop.eup %234  ;;  %v170_v30 = vmul.f32 0.06666667, %v169_v27  ;;  %236 = vlog2.f32 %v118_v28  ;;  %vm120_vm2 = vcmp.eq.f32.partialorder %v118_v28, 1.0 }
  0xcb   :  { %v122_v31 = vmul.f32 0.6931472, %v235_v29 }
  0xcc   :  { %v171_v34 = vsub.f32 %v57_v2, %v170_v30 }
  0xcd   :  { %v125_v35 = vsel %vm119_vm1, %v231_v19, %v122_v31 }
  0xce   :  { %v129_v37 = vsub.f32 %v127_v32, %v125_v35  ;;  %v135_v38 = vsub.f32 %v133_v33, %v125_v35  ;;  %v172_v39 = vand.u32 2147483647, %v171_v34  ;;  %v183_v4 = vmax.f32 %v171_v34, 0.0 }
  0xcf   :  { %v181_v9 = vmin.f32 %v171_v34, 0.0 }
  0xd0   :  { %v237_v40 = vpop.eup %236  ;;  %v137_v41 = vmax.f32 %v129_v37, -18.420681  ;;  %v143_v42 = vmax.f32 %v135_v38, -18.420681  ;;  %v173_v43 = vsub.f32 0.0, %v172_v39  ;;  %v184_v10 = vsub.f32 0.0, %v183_v4 }
  0xd1   :  { %v124_v46 = vmul.f32 0.6931472, %v237_v40 }
  0xd2   :  { %v174_v48 = vmul.f32 1.442695, %v173_v43  ;;  %v139_v50 = vmul.f32 %v137_v41, %v346_v24  ;;  %v145_v53 = vmul.f32 %v143_v42, %v141_v44 }
  0xd3   :  { %v126_v51 = vsel %vm120_vm2, %v233_v25, %v124_v46 }
  0xd4   :  { %238 = vpow2.f32 %v174_v48  ;;  %v130_v54 = vsub.f32 %v128_v49, %v126_v51  ;;  %v136_v55 = vsub.f32 %v134_v47, %v126_v51  ;;  %v147_v58 = vadd.f32 %v145_v53, %v139_v50 }
  0xd6   :  { %v138_v56 = vmax.f32 %v130_v54, -18.420681  ;;  %v144_v57 = vmax.f32 %v136_v55, -18.420681  ;;  %v150_v0 = vsel %vm149_vm0, %v147_v58, 0.0 }
  0xd8   :  { %v140_v59 = vmul.f32 %v138_v56, %v91_v45  ;;  %v146_v60 = vmul.f32 %v144_v57, %v142_v52 }
  0xda   :  { %v239_v61 = vpop.eup %238  ;;  %v148_v62 = vadd.f32 %v146_v60, %v140_v59 }
  0xdb   :  { %v176_v63 = vadd.f32 1.0, %v239_v61 }
  0xdc   :  { %v151_v1 = vsel %vm149_vm0, %v148_v62, 0.0 }
  0xdd   :  { %240 = vlog2.f32 %v176_v63  ;;  %v152_v2 = vadd.f32 %v151_v1, %v150_v0  ;;  %vm177_vm3 = vcmp.eq.f32.partialorder %v176_v63, 1.0 }
  0xdf   :  { %v153_v3 = vrot.slane %v152_v2, 4 }
  0xe1   :  { %v154_v5 = vadd.f32 %v153_v3, %v152_v2 }
  0xe3   :  { %v241_v6 = vpop.eup %240  ;;  %v155_v7 = vrot.slane %v154_v5, 2 }
  0xe4   :  { %v179_v8 = vmul.f32 0.6931472, %v241_v6 }
  0xe5   :  { %v156_v11 = vadd.f32 %v155_v7, %v154_v5 }
  0xe6   :  { %v180_v12 = vsel %vm177_vm3, %v239_v61, %v179_v8 }
  0xe7   :  { %v182_v13 = vsub.f32 %v181_v9, %v180_v12  ;;  %v185_v14 = vsub.f32 %v184_v10, %v180_v12  ;;  %v157_v15 = vrot.slane %v156_v11, 1 }
  0xe9   :  { %v186_v16 = vmax.f32 %v182_v13, -18.420681  ;;  %v188_v17 = vmax.f32 %v185_v14, -18.420681  ;;  %v158_v18 = vadd.f32 %v157_v15, %v156_v11 }
  0xeb   :  { %v187_v19 = vmul.f32 %v186_v16, %v346_v24  ;;  %v189_v20 = vmul.f32 %v188_v17, %v141_v44  ;;  %v159_v21 = vsub.f32 %v158_v18, %v147_v58 }
  0xed   :  { %v190_v22 = vadd.f32 %v189_v20, %v187_v19 }
  0xef   :  { %v191_v23 = vadd.f32 %v190_v22, %v159_v21 }
  0xf1   :  { %v193_v25 = vsel %vm192_vm4, %v191_v23, 0.0 }
  0xf2   :  { %194 = vadd.xlane.f32.xlu1 %v193_v25 }
 0x165   :  { %v195_v26 = vpop.xlane.xlu1 %194 }
 0x166   :  { %v196_v27 = vrot.slane %v195_v26, 4 }
 0x168   :  { %v197_v28 = vadd.f32 %v196_v27, %v195_v26 }
 0x16a   :  { %v198_v29 = vrot.slane %v197_v28, 2 }
 0x16c   :  { %v199_v30 = vadd.f32 %v198_v29, %v197_v28 }
 0x16e   :  { %v200_v31 = vrot.slane %v199_v30, 1 }
 0x170   :  { %v201_v32 = vadd.f32 %v200_v31, %v199_v30 }
 0x172   :  { %224 = vpush %v201_v32 }
 0x1a3   :  { %s225_s22 = spop %224 }
 0x1a4   :  { %s203_s23 = ssub.f32 0.0, %s225_s22 }
 0x1a6   :  { %v204_v24 = vstv %s203_s23 }
 0x1a7   :  { %205 = vst [vmem:[#allocation7] sm:$0xff] %v204_v24 }
 0x1a8   :  { %216 = dma.vmem_to_hbm [thread:$0]  %s212_s1, 128, %s214_s21, [#allocation4]  }
 0x1a9   :  { %318 = dma.done.wait [#allocation4], 128  }
 0x1aa   :  { %319 = vsyncadd [#allocation4], 4294967168 }
 0x1ab   :  { %221 = vsyncpa [#allocation3], 1 }
 0x1ac   :  { %222 = vsyncpa [#allocation6], 1 }
 0x1ad   :  { %223 = vsyncpa [#allocation4], 1 }

</bundles_post_ra>
